<compile_context>
chip_gen: v7x
topology: tpu7x:2x2x1
jax: 0.10.0
libtpu: 0.0.40
codegen_flags: <defaults>
</compile_context>

<pallas_src>
import numpy as np
import jax
import jax.numpy as jnp
from jax.experimental import pallas as pl
from jax.experimental.pallas import tpu as pltpu

# ----------------------------- problem sizes -----------------------------
N, CIN, H, W = 2, 4, 16, 16          # input  (N, CIN, H, W)  NCHW
C1, C2, F = 8, 16, 32                # conv1/conv2 channels, feature dim
H2, W2 = H // 2, W // 2
H4, W4 = H // 4, W // 4
HW, HW2, HW4 = H * W, H2 * W2, H4 * W4
CF = C2 * F                          # FC lane-concatenated width (512)

# iota masks / lane folds rely on powers of two (correctness-review item)
for _v in (H, W, C2, F):
    assert _v > 0 and (_v & (_v - 1)) == 0, "H, W, C2, F must be powers of two"

K1 = 9 * N * CIN                     # conv-1 stacked contraction depth (72)
K2 = 9 * N * C1                      # conv-2 stacked contraction depth (144)

# row offsets inside the packed bf16 weight buffer (all multiples of 16 = bf16 tile rows)
OW1 = 0
OW2 = OW1 + N * C1                   # 16
OG2 = OW2 + N * C2                   # 48
OWFC = OG2 + HW2                     # 112
WB_ROWS = OWFC + HW4                 # 128

# row offsets inside the packed f32 bias buffer
OB1 = 0
OB2 = OB1 + N * C1                   # 16
OBFC = OB2 + N * C2                  # 48
BB_ROWS = ((OBFC + 1 + 7) // 8) * 8  # 56


# ------------------- small constant operator matrices (setup glue) -------------------
def build_pool_select(hs, ws):
    """G[(2y)*ws + 2x, y*(ws//2) + x] = 1 : keeps the top-left element of every 2x2 window
    (applied AFTER the in-kernel roll+max, so it implements the stride-2 compaction only)."""
    ho, wo = hs // 2, ws // 2
    g = np.zeros((hs * ws, ho * wo), np.float32)
    for y in range(ho):
        for x in range(wo):
            g[(2 * y) * ws + 2 * x, y * wo + x] = 1.0
    return g


# ------------------------------ fused Pallas kernel ------------------------------
def fused_feature_kernel(x_ref, wb_ref, g1_ref, bb_ref, o_ref):
    f32, bf16 = jnp.float32, jnp.bfloat16

    def conv3x3_relu(inp, w_cat, bias, hs, ws):
        """inp: (rows_in, hs*ws) f32; w_cat: (rows_out, 9*rows_in) bf16, tap-major
        concatenation of the batch-block-diagonal per-tap weights; bias: (rows_out,1) f32.
        Returns ReLU(conv + bias) as (rows_out, hs*ws) f32 using ONE matmul."""
        s = hs * ws
        log2w = ws.bit_length() - 1
        col = jax.lax.broadcasted_iota(jnp.int32, (1, s), 1)
        yy = col >> log2w                                  # row inside image
        xx = col & (ws - 1)                                # col inside image
        # boundary masks hoisted out of the tap loop (built once per stage)
        row_masks = [yy >= 1, None, yy <= hs - 2]          # dy = 0, 1, 2
        col_masks = [xx >= 1, None, xx <= ws - 2]          # dx = 0, 1, 2
        taps = []
        for dy in range(3):
            for dx in range(3):
                off = (dy - 1) * ws + (dx - 1)
                # shifted[p] = inp[p + off] (per sublane row); boundary handled by mask.
                shifted = inp if off == 0 else pltpu.roll(inp, shift=(-off) % s, axis=1)
                my, mx = row_masks[dy], col_masks[dx]
                mask = my if mx is None else (mx if my is None else jnp.logical_and(my, mx))
                if mask is not None:
                    shifted = jnp.where(mask, shifted, 0.0)
                taps.append(shifted)
        stacked = jnp.concatenate(taps, axis=0).astype(bf16)       # (9*rows_in, s)
        acc = jnp.dot(w_cat, stacked, preferred_element_type=f32)  # single MXU op
        return jnp.maximum(acc + bias, 0.0)

    def maxpool2(h, ws_img, g):
        """2x2/stride-2 max pool: roll+max (window max, XLU/VPU) then one 0/1
        compaction matmul against the precomputed selector g."""
        s = h.shape[1]
        t = jnp.maximum(h, pltpu.roll(h, shift=s - 1, axis=1))        # max with right neighbor
        m = jnp.maximum(t, pltpu.roll(t, shift=s - ws_img, axis=1))   # max with row below
        return jnp.dot(m.astype(bf16), g, preferred_element_type=f32)

    # --- unpack the packed constant buffers (static, tile-aligned slices) ---
    w1c = wb_ref[pl.ds(OW1, N * C1), pl.ds(0, K1)]       # (16, 72)   bf16
    w2c = wb_ref[pl.ds(OW2, N * C2), pl.ds(0, K2)]       # (32, 144)  bf16
    g2 = wb_ref[pl.ds(OG2, HW2), pl.ds(0, HW4)]          # (64, 16)   bf16
    wfc = wb_ref[pl.ds(OWFC, HW4), pl.ds(0, CF)]         # (16, 512)  bf16
    g1 = g1_ref[...]                                     # (256, 64)  bf16
    b1 = bb_ref[pl.ds(OB1, N * C1), pl.ds(0, 1)]         # (16, 1)    f32
    b2 = bb_ref[pl.ds(OB2, N * C2), pl.ds(0, 1)]         # (32, 1)    f32
    bfc = bb_ref[pl.ds(OBFC, 1), pl.ds(0, F)]            # (1, 32)    f32

    x = x_ref[...]                                       # (N*CIN, H*W) f32
    h1 = conv3x3_relu(x, w1c, b1, H, W)                  # (N*C1, HW)
    p1 = maxpool2(h1, W, g1)                             # (N*C1, HW2)
    h2 = conv3x3_relu(p1, w2c, b2, H2, W2)               # (N*C2, HW2)
    p2 = maxpool2(h2, W2, g2)                            # (N*C2, HW4)

    # --- fused flatten (C,H,W order) + Linear ---
    # y[n*C2+c2, c2'*F+f] = sum_j p2[n*C2+c2, j] * wfc[f, c2'*HW4+j]
    y = jnp.dot(p2.astype(bf16), wfc, preferred_element_type=f32)    # (N*C2, C2*F)
    log2f = F.bit_length() - 1
    r_io = jax.lax.broadcasted_iota(jnp.int32, (N * C2, 1), 0)
    c_io = jax.lax.broadcasted_iota(jnp.int32, (1, CF), 1)
    keep = (r_io & (C2 - 1)) == (c_io >> log2f)          # keep only c2' == c2 blocks
    y = jnp.where(keep, y, 0.0)
    # per-image row sum (selection matmul, selector generated from iotas)
    log2c2 = C2.bit_length() - 1
    n_io = jax.lax.broadcasted_iota(jnp.int32, (N, 1), 0)
    g_io = jax.lax.broadcasted_iota(jnp.int32, (1, N * C2), 1)
    rsel = jnp.where((g_io >> log2c2) == n_io, 1.0, 0.0).astype(bf16)   # (N, N*C2)
    z = jnp.dot(rsel, y.astype(bf16), preferred_element_type=f32)       # (N, C2*F)
    # fold the C2 F-wide lane blocks together: log2(C2) roll+add steps (XLU, f32)
    d = CF // 2
    while d >= F:
        z = z + pltpu.roll(z, shift=CF - d, axis=1)
        d //= 2
    o_ref[...] = z[:, :F] + bfc                          # single (N, F) store


# ------------------------------ one-time parameter prep ------------------------------
def prepare_params(params):
    """Reformat PyTorch-convention weights once (hoisted out of the forward path)."""
    w1, b1, w2, b2, wfc, bfc = params
    bf16 = jnp.bfloat16
    eye = jnp.eye(N, dtype=jnp.float32)

    # per-tap conv weights -> block-diagonal over batch -> tap-major lane concatenation
    w1m = w1.reshape(C1, CIN, 9).transpose(2, 0, 1)                                   # (9, C1, CIN)
    w1blk = jnp.einsum('kab,nm->knamb', w1m, eye).reshape(9, N * C1, N * CIN)
    w1cat = w1blk.transpose(1, 0, 2).reshape(N * C1, K1)                              # (16, 72)
    w2m = w2.reshape(C2, C1, 9).transpose(2, 0, 1)                                    # (9, C2, C1)
    w2blk = jnp.einsum('kab,nm->knamb', w2m, eye).reshape(9, N * C2, N * C1)
    w2cat = w2blk.transpose(1, 0, 2).reshape(N * C2, K2)                              # (32, 144)

    # pool compaction selectors
    gsel1 = jnp.asarray(build_pool_select(H, W))                                      # (256, 64)
    gsel2 = jnp.asarray(build_pool_select(H2, W2))                                    # (64, 16)

    # FC weight permuted so wfc_cat[j, c2*F + f] == wfc[f, c2*HW4 + j]  (PyTorch flatten order)
    wfc_cat = wfc.reshape(F, C2, HW4).transpose(2, 1, 0).reshape(HW4, CF)             # (16, 512)

    # packed bf16 weight buffer (one DMA for all matmul operands except gsel1)
    wb = jnp.zeros((WB_ROWS, CF), bf16)
    wb = wb.at[OW1:OW1 + N * C1, :K1].set(w1cat.astype(bf16))
    wb = wb.at[OW2:OW2 + N * C2, :K2].set(w2cat.astype(bf16))
    wb = wb.at[OG2:OG2 + HW2, :HW4].set(gsel2.astype(bf16))
    wb = wb.at[OWFC:OWFC + HW4, :].set(wfc_cat.astype(bf16))

    # packed f32 bias buffer (one DMA for all biases)
    bb = jnp.zeros((BB_ROWS, F), jnp.float32)
    bb = bb.at[OB1:OB1 + N * C1, 0:1].set(jnp.tile(b1, N).reshape(N * C1, 1))
    bb = bb.at[OB2:OB2 + N * C2, 0:1].set(jnp.tile(b2, N).reshape(N * C2, 1))
    bb = bb.at[OBFC:OBFC + 1, :F].set(bfc.reshape(1, F))

    return (wb, gsel1.astype(bf16), bb)


# ------------------------------ wrapper (single fused call) ------------------------------
@jax.jit
def get_feature_pallas(x_nchw, prepped):
    wb, gsel1, bb = prepped
    # NCHW -> (N*CIN, H*W): batch/channels on sublanes, flattened spatial on lanes.
    x_rows = x_nchw.reshape(N * CIN, H * W).astype(jnp.float32)
    vmem = lambda: pl.BlockSpec(memory_space=pltpu.MemorySpace.VMEM)
    return pl.pallas_call(
        fused_feature_kernel,
        out_shape=jax.ShapeDtypeStruct((N, F), jnp.float32),
        in_specs=[vmem(), vmem(), vmem(), vmem()],
        out_specs=vmem(),
    )(x_rows, wb, gsel1, bb)


# --------------------------- pure-JAX reference ---------------------------
def ref_get_feature(x_nchw, params):
    w1, b1, w2, b2, wfc, bfc = params
    dn = ("NCHW", "OIHW", "NCHW")
    hp = jax.lax.Precision.HIGHEST
    y = jax.lax.conv_general_dilated(x_nchw, w1, (1, 1), ((1, 1), (1, 1)),
                                     dimension_numbers=dn, precision=hp)
    y = jnp.maximum(y + b1[None, :, None, None], 0.0)
    y = jax.lax.reduce_window(y, -jnp.inf, jax.lax.max, (1, 1, 2, 2), (1, 1, 2, 2), "VALID")
    y = jax.lax.conv_general_dilated(y, w2, (1, 1), ((1, 1), (1, 1)),
                                     dimension_numbers=dn, precision=hp)
    y = jnp.maximum(y + b2[None, :, None, None], 0.0)
    y = jax.lax.reduce_window(y, -jnp.inf, jax.lax.max, (1, 1, 2, 2), (1, 1, 2, 2), "VALID")
    y = y.reshape(y.shape[0], -1)                          # (N, C2*H4*W4), (C,H,W) order
    return jnp.dot(y, wfc.T, precision=hp) + bfc[None, :]


# ----------------------------------- main -----------------------------------
if __name__ == "__main__":
    key = jax.random.PRNGKey(0)
    kx, k1, k2, k3, k4, k5, k6 = jax.random.split(key, 7)

    x = jax.random.normal(kx, (N, CIN, H, W), jnp.float32)            # NCHW input

    # deterministic synthetic parameters (PyTorch-convention shapes)
    w1 = 0.1 * jax.random.normal(k1, (C1, CIN, 3, 3), jnp.float32)    # OIHW
    b1 = 0.1 * jax.random.normal(k2, (C1,), jnp.float32)
    w2 = 0.1 * jax.random.normal(k3, (C2, C1, 3, 3), jnp.float32)
    b2 = 0.1 * jax.random.normal(k4, (C2,), jnp.float32)
    wfc = 0.1 * jax.random.normal(k5, (F, C2 * HW4), jnp.float32)     # (out, in)
    bfc = 0.1 * jax.random.normal(k6, (F,), jnp.float32)
    params = (w1, b1, w2, b2, wfc, bfc)

    prepped = prepare_params(params)                                   # one-time weight prep

    out = jax.block_until_ready(get_feature_pallas(x, prepped))
    ref = jax.block_until_ready(ref_get_feature(x, params))

    assert out.shape == (N, F) and out.dtype == jnp.float32
    assert jnp.allclose(out, ref, rtol=2e-2, atol=2e-2), \
        f"mismatch: max abs err = {float(jnp.max(jnp.abs(out - ref)))}"
    print("KERNEL_OK")
</pallas_src>

<mosaic_0001>
module attributes {stable_mosaic.version = 11 : i64} {
  func.func @fused_feature_kernel(%arg0: memref<8x256xf32, #tpu.memory_space<vmem>>, %arg1: memref<128x512xbf16, #tpu.memory_space<vmem>>, %arg2: memref<256x64xbf16, #tpu.memory_space<vmem>>, %arg3: memref<56x32xf32, #tpu.memory_space<vmem>>, %arg4: memref<2x32xf32, #tpu.memory_space<vmem>>) attributes {dimension_semantics = [], scalar_prefetch = 0 : i64, scratch_operands = 0 : i64, tpu.core_type = #tpu.core_type<tc>} {
    %c0 = arith.constant 0 : index
    %c0_0 = arith.constant 0 : index
    %0 = vector.load %arg1[%c0, %c0_0] : memref<128x512xbf16, #tpu.memory_space<vmem>>, vector<16x72xbf16>
    %c16 = arith.constant 16 : index
    %c0_1 = arith.constant 0 : index
    %1 = vector.load %arg1[%c16, %c0_1] : memref<128x512xbf16, #tpu.memory_space<vmem>>, vector<32x144xbf16>
    %c48 = arith.constant 48 : index
    %c0_2 = arith.constant 0 : index
    %2 = vector.load %arg1[%c48, %c0_2] : memref<128x512xbf16, #tpu.memory_space<vmem>>, vector<64x16xbf16>
    %c112 = arith.constant 112 : index
    %c0_3 = arith.constant 0 : index
    %3 = vector.load %arg1[%c112, %c0_3] : memref<128x512xbf16, #tpu.memory_space<vmem>>, vector<16x512xbf16>
    %c0_4 = arith.constant 0 : index
    %c0_5 = arith.constant 0 : index
    %4 = vector.load %arg2[%c0_4, %c0_5] : memref<256x64xbf16, #tpu.memory_space<vmem>>, vector<256x64xbf16>
    %c0_6 = arith.constant 0 : index
    %c0_7 = arith.constant 0 : index
    %5 = vector.load %arg3[%c0_6, %c0_7] : memref<56x32xf32, #tpu.memory_space<vmem>>, vector<16x1xf32>
    %c16_8 = arith.constant 16 : index
    %c0_9 = arith.constant 0 : index
    %6 = vector.load %arg3[%c16_8, %c0_9] : memref<56x32xf32, #tpu.memory_space<vmem>>, vector<32x1xf32>
    %c48_10 = arith.constant 48 : index
    %c0_11 = arith.constant 0 : index
    %7 = vector.load %arg3[%c48_10, %c0_11] : memref<56x32xf32, #tpu.memory_space<vmem>>, vector<1x32xf32>
    %c0_12 = arith.constant 0 : index
    %c0_13 = arith.constant 0 : index
    %8 = vector.load %arg0[%c0_12, %c0_13] : memref<8x256xf32, #tpu.memory_space<vmem>>, vector<8x256xf32>
    %9 = tpu.iota {dimensions = array<i32: 1>} : vector<1x256xi32>
    %c4_i32 = arith.constant 4 : i32
    %10 = vector.broadcast %c4_i32 : i32 to vector<1x256xi32>
    %11 = arith.shrsi %9, %10 : vector<1x256xi32>
    %c15_i32 = arith.constant 15 : i32
    %12 = vector.broadcast %c15_i32 : i32 to vector<1x256xi32>
    %13 = arith.andi %9, %12 : vector<1x256xi32>
    %c1_i32 = arith.constant 1 : i32
    %14 = vector.broadcast %c1_i32 : i32 to vector<1x256xi32>
    %15 = arith.cmpi sge, %11, %14 : vector<1x256xi32>
    %c14_i32 = arith.constant 14 : i32
    %16 = vector.broadcast %c14_i32 : i32 to vector<1x256xi32>
    %17 = arith.cmpi sle, %11, %16 : vector<1x256xi32>
    %c1_i32_14 = arith.constant 1 : i32
    %18 = vector.broadcast %c1_i32_14 : i32 to vector<1x256xi32>
    %19 = arith.cmpi sge, %13, %18 : vector<1x256xi32>
    %c14_i32_15 = arith.constant 14 : i32
    %20 = vector.broadcast %c14_i32_15 : i32 to vector<1x256xi32>
    %21 = arith.cmpi sle, %13, %20 : vector<1x256xi32>
    %c17_i32 = arith.constant 17 : i32
    %22 = tpu.dynamic_rotate %8 by %c17_i32 dim 1 : vector<8x256xf32>, i32 -> vector<8x256xf32>
    %23 = arith.andi %15, %19 : vector<1x256xi1>
    %cst = arith.constant 0.000000e+00 : f32
    %24 = vector.shape_cast %23 : vector<1x256xi1> to vector<1x256xi1>
    %25 = vector.broadcast %24 : vector<1x256xi1> to vector<8x256xi1>
    %26 = vector.broadcast %cst : f32 to vector<8x256xf32>
    %27 = arith.select %25, %22, %26 : vector<8x256xi1>, vector<8x256xf32>
    %c16_i32 = arith.constant 16 : i32
    %28 = tpu.dynamic_rotate %8 by %c16_i32 dim 1 : vector<8x256xf32>, i32 -> vector<8x256xf32>
    %cst_16 = arith.constant 0.000000e+00 : f32
    %29 = vector.shape_cast %15 : vector<1x256xi1> to vector<1x256xi1>
    %30 = vector.broadcast %29 : vector<1x256xi1> to vector<8x256xi1>
    %31 = vector.broadcast %cst_16 : f32 to vector<8x256xf32>
    %32 = arith.select %30, %28, %31 : vector<8x256xi1>, vector<8x256xf32>
    %c15_i32_17 = arith.constant 15 : i32
    %33 = tpu.dynamic_rotate %8 by %c15_i32_17 dim 1 : vector<8x256xf32>, i32 -> vector<8x256xf32>
    %34 = arith.andi %15, %21 : vector<1x256xi1>
    %cst_18 = arith.constant 0.000000e+00 : f32
    %35 = vector.shape_cast %34 : vector<1x256xi1> to vector<1x256xi1>
    %36 = vector.broadcast %35 : vector<1x256xi1> to vector<8x256xi1>
    %37 = vector.broadcast %cst_18 : f32 to vector<8x256xf32>
    %38 = arith.select %36, %33, %37 : vector<8x256xi1>, vector<8x256xf32>
    %c1_i32_19 = arith.constant 1 : i32
    %39 = tpu.dynamic_rotate %8 by %c1_i32_19 dim 1 : vector<8x256xf32>, i32 -> vector<8x256xf32>
    %cst_20 = arith.constant 0.000000e+00 : f32
    %40 = vector.shape_cast %19 : vector<1x256xi1> to vector<1x256xi1>
    %41 = vector.broadcast %40 : vector<1x256xi1> to vector<8x256xi1>
    %42 = vector.broadcast %cst_20 : f32 to vector<8x256xf32>
    %43 = arith.select %41, %39, %42 : vector<8x256xi1>, vector<8x256xf32>
    %c255_i32 = arith.constant 255 : i32
    %44 = tpu.dynamic_rotate %8 by %c255_i32 dim 1 : vector<8x256xf32>, i32 -> vector<8x256xf32>
    %cst_21 = arith.constant 0.000000e+00 : f32
    %45 = vector.shape_cast %21 : vector<1x256xi1> to vector<1x256xi1>
    %46 = vector.broadcast %45 : vector<1x256xi1> to vector<8x256xi1>
    %47 = vector.broadcast %cst_21 : f32 to vector<8x256xf32>
    %48 = arith.select %46, %44, %47 : vector<8x256xi1>, vector<8x256xf32>
    %c241_i32 = arith.constant 241 : i32
    %49 = tpu.dynamic_rotate %8 by %c241_i32 dim 1 : vector<8x256xf32>, i32 -> vector<8x256xf32>
    %50 = arith.andi %17, %19 : vector<1x256xi1>
    %cst_22 = arith.constant 0.000000e+00 : f32
    %51 = vector.shape_cast %50 : vector<1x256xi1> to vector<1x256xi1>
    %52 = vector.broadcast %51 : vector<1x256xi1> to vector<8x256xi1>
    %53 = vector.broadcast %cst_22 : f32 to vector<8x256xf32>
    %54 = arith.select %52, %49, %53 : vector<8x256xi1>, vector<8x256xf32>
    %c240_i32 = arith.constant 240 : i32
    %55 = tpu.dynamic_rotate %8 by %c240_i32 dim 1 : vector<8x256xf32>, i32 -> vector<8x256xf32>
    %cst_23 = arith.constant 0.000000e+00 : f32
    %56 = vector.shape_cast %17 : vector<1x256xi1> to vector<1x256xi1>
    %57 = vector.broadcast %56 : vector<1x256xi1> to vector<8x256xi1>
    %58 = vector.broadcast %cst_23 : f32 to vector<8x256xf32>
    %59 = arith.select %57, %55, %58 : vector<8x256xi1>, vector<8x256xf32>
    %c239_i32 = arith.constant 239 : i32
    %60 = tpu.dynamic_rotate %8 by %c239_i32 dim 1 : vector<8x256xf32>, i32 -> vector<8x256xf32>
    %61 = arith.andi %17, %21 : vector<1x256xi1>
    %cst_24 = arith.constant 0.000000e+00 : f32
    %62 = vector.shape_cast %61 : vector<1x256xi1> to vector<1x256xi1>
    %63 = vector.broadcast %62 : vector<1x256xi1> to vector<8x256xi1>
    %64 = vector.broadcast %cst_24 : f32 to vector<8x256xf32>
    %65 = arith.select %63, %60, %64 : vector<8x256xi1>, vector<8x256xf32>
    %66 = tpu.concatenate %27, %32, %38, %43, %8, %48, %54, %59, %65 in 0 : vector<8x256xf32>, vector<8x256xf32>, vector<8x256xf32>, vector<8x256xf32>, vector<8x256xf32>, vector<8x256xf32>, vector<8x256xf32>, vector<8x256xf32>, vector<8x256xf32> -> vector<72x256xf32>
    %67 = arith.truncf %66 : vector<72x256xf32> to vector<72x256xbf16>
    %cst_25 = arith.constant dense<0.000000e+00> : vector<16x256xf32>
    %68 = tpu.matmul %0, %67, %cst_25 {dimension_numbers = #tpu.dot_dimension_numbers<[1], [0], [0], [1], [0, 0, 1, 1], [], []>} : vector<16x72xbf16>, vector<72x256xbf16>, vector<16x256xf32> -> vector<16x256xf32>
    %69 = vector.broadcast %5 : vector<16x1xf32> to vector<16x256xf32>
    %70 = arith.addf %68, %69 : vector<16x256xf32>
    %cst_26 = arith.constant 0.000000e+00 : f32
    %71 = vector.broadcast %cst_26 : f32 to vector<16x256xf32>
    %72 = arith.maximumf %70, %71 : vector<16x256xf32>
    %c255_i32_27 = arith.constant 255 : i32
    %73 = tpu.dynamic_rotate %72 by %c255_i32_27 dim 1 : vector<16x256xf32>, i32 -> vector<16x256xf32>
    %74 = arith.maximumf %72, %73 : vector<16x256xf32>
    %c240_i32_28 = arith.constant 240 : i32
    %75 = tpu.dynamic_rotate %74 by %c240_i32_28 dim 1 : vector<16x256xf32>, i32 -> vector<16x256xf32>
    %76 = arith.maximumf %74, %75 : vector<16x256xf32>
    %77 = arith.truncf %76 : vector<16x256xf32> to vector<16x256xbf16>
    %cst_29 = arith.constant dense<0.000000e+00> : vector<16x64xf32>
    %78 = tpu.matmul %77, %4, %cst_29 {dimension_numbers = #tpu.dot_dimension_numbers<[1], [0], [0], [1], [0, 0, 1, 1], [], []>} : vector<16x256xbf16>, vector<256x64xbf16>, vector<16x64xf32> -> vector<16x64xf32>
    %79 = tpu.iota {dimensions = array<i32: 1>} : vector<1x64xi32>
    %c3_i32 = arith.constant 3 : i32
    %80 = vector.broadcast %c3_i32 : i32 to vector<1x64xi32>
    %81 = arith.shrsi %79, %80 : vector<1x64xi32>
    %c7_i32 = arith.constant 7 : i32
    %82 = vector.broadcast %c7_i32 : i32 to vector<1x64xi32>
    %83 = arith.andi %79, %82 : vector<1x64xi32>
    %c1_i32_30 = arith.constant 1 : i32
    %84 = vector.broadcast %c1_i32_30 : i32 to vector<1x64xi32>
    %85 = arith.cmpi sge, %81, %84 : vector<1x64xi32>
    %c6_i32 = arith.constant 6 : i32
    %86 = vector.broadcast %c6_i32 : i32 to vector<1x64xi32>
    %87 = arith.cmpi sle, %81, %86 : vector<1x64xi32>
    %c1_i32_31 = arith.constant 1 : i32
    %88 = vector.broadcast %c1_i32_31 : i32 to vector<1x64xi32>
    %89 = arith.cmpi sge, %83, %88 : vector<1x64xi32>
    %c6_i32_32 = arith.constant 6 : i32
    %90 = vector.broadcast %c6_i32_32 : i32 to vector<1x64xi32>
    %91 = arith.cmpi sle, %83, %90 : vector<1x64xi32>
    %c9_i32 = arith.constant 9 : i32
    %92 = tpu.dynamic_rotate %78 by %c9_i32 dim 1 : vector<16x64xf32>, i32 -> vector<16x64xf32>
    %93 = arith.andi %85, %89 : vector<1x64xi1>
    %cst_33 = arith.constant 0.000000e+00 : f32
    %94 = vector.shape_cast %93 : vector<1x64xi1> to vector<1x64xi1>
    %95 = vector.broadcast %94 : vector<1x64xi1> to vector<16x64xi1>
    %96 = vector.broadcast %cst_33 : f32 to vector<16x64xf32>
    %97 = arith.select %95, %92, %96 : vector<16x64xi1>, vector<16x64xf32>
    %c8_i32 = arith.constant 8 : i32
    %98 = tpu.dynamic_rotate %78 by %c8_i32 dim 1 : vector<16x64xf32>, i32 -> vector<16x64xf32>
    %cst_34 = arith.constant 0.000000e+00 : f32
    %99 = vector.shape_cast %85 : vector<1x64xi1> to vector<1x64xi1>
    %100 = vector.broadcast %99 : vector<1x64xi1> to vector<16x64xi1>
    %101 = vector.broadcast %cst_34 : f32 to vector<16x64xf32>
    %102 = arith.select %100, %98, %101 : vector<16x64xi1>, vector<16x64xf32>
    %c7_i32_35 = arith.constant 7 : i32
    %103 = tpu.dynamic_rotate %78 by %c7_i32_35 dim 1 : vector<16x64xf32>, i32 -> vector<16x64xf32>
    %104 = arith.andi %85, %91 : vector<1x64xi1>
    %cst_36 = arith.constant 0.000000e+00 : f32
    %105 = vector.shape_cast %104 : vector<1x64xi1> to vector<1x64xi1>
    %106 = vector.broadcast %105 : vector<1x64xi1> to vector<16x64xi1>
    %107 = vector.broadcast %cst_36 : f32 to vector<16x64xf32>
    %108 = arith.select %106, %103, %107 : vector<16x64xi1>, vector<16x64xf32>
    %c1_i32_37 = arith.constant 1 : i32
    %109 = tpu.dynamic_rotate %78 by %c1_i32_37 dim 1 : vector<16x64xf32>, i32 -> vector<16x64xf32>
    %cst_38 = arith.constant 0.000000e+00 : f32
    %110 = vector.shape_cast %89 : vector<1x64xi1> to vector<1x64xi1>
    %111 = vector.broadcast %110 : vector<1x64xi1> to vector<16x64xi1>
    %112 = vector.broadcast %cst_38 : f32 to vector<16x64xf32>
    %113 = arith.select %111, %109, %112 : vector<16x64xi1>, vector<16x64xf32>
    %c63_i32 = arith.constant 63 : i32
    %114 = tpu.dynamic_rotate %78 by %c63_i32 dim 1 : vector<16x64xf32>, i32 -> vector<16x64xf32>
    %cst_39 = arith.constant 0.000000e+00 : f32
    %115 = vector.shape_cast %91 : vector<1x64xi1> to vector<1x64xi1>
    %116 = vector.broadcast %115 : vector<1x64xi1> to vector<16x64xi1>
    %117 = vector.broadcast %cst_39 : f32 to vector<16x64xf32>
    %118 = arith.select %116, %114, %117 : vector<16x64xi1>, vector<16x64xf32>
    %c57_i32 = arith.constant 57 : i32
    %119 = tpu.dynamic_rotate %78 by %c57_i32 dim 1 : vector<16x64xf32>, i32 -> vector<16x64xf32>
    %120 = arith.andi %87, %89 : vector<1x64xi1>
    %cst_40 = arith.constant 0.000000e+00 : f32
    %121 = vector.shape_cast %120 : vector<1x64xi1> to vector<1x64xi1>
    %122 = vector.broadcast %121 : vector<1x64xi1> to vector<16x64xi1>
    %123 = vector.broadcast %cst_40 : f32 to vector<16x64xf32>
    %124 = arith.select %122, %119, %123 : vector<16x64xi1>, vector<16x64xf32>
    %c56_i32 = arith.constant 56 : i32
    %125 = tpu.dynamic_rotate %78 by %c56_i32 dim 1 : vector<16x64xf32>, i32 -> vector<16x64xf32>
    %cst_41 = arith.constant 0.000000e+00 : f32
    %126 = vector.shape_cast %87 : vector<1x64xi1> to vector<1x64xi1>
    %127 = vector.broadcast %126 : vector<1x64xi1> to vector<16x64xi1>
    %128 = vector.broadcast %cst_41 : f32 to vector<16x64xf32>
    %129 = arith.select %127, %125, %128 : vector<16x64xi1>, vector<16x64xf32>
    %c55_i32 = arith.constant 55 : i32
    %130 = tpu.dynamic_rotate %78 by %c55_i32 dim 1 : vector<16x64xf32>, i32 -> vector<16x64xf32>
    %131 = arith.andi %87, %91 : vector<1x64xi1>
    %cst_42 = arith.constant 0.000000e+00 : f32
    %132 = vector.shape_cast %131 : vector<1x64xi1> to vector<1x64xi1>
    %133 = vector.broadcast %132 : vector<1x64xi1> to vector<16x64xi1>
    %134 = vector.broadcast %cst_42 : f32 to vector<16x64xf32>
    %135 = arith.select %133, %130, %134 : vector<16x64xi1>, vector<16x64xf32>
    %136 = tpu.concatenate %97, %102, %108, %113, %78, %118, %124, %129, %135 in 0 : vector<16x64xf32>, vector<16x64xf32>, vector<16x64xf32>, vector<16x64xf32>, vector<16x64xf32>, vector<16x64xf32>, vector<16x64xf32>, vector<16x64xf32>, vector<16x64xf32> -> vector<144x64xf32>
    %137 = arith.truncf %136 : vector<144x64xf32> to vector<144x64xbf16>
    %cst_43 = arith.constant dense<0.000000e+00> : vector<32x64xf32>
    %138 = tpu.matmul %1, %137, %cst_43 {dimension_numbers = #tpu.dot_dimension_numbers<[1], [0], [0], [1], [0, 0, 1, 1], [], []>} : vector<32x144xbf16>, vector<144x64xbf16>, vector<32x64xf32> -> vector<32x64xf32>
    %139 = vector.broadcast %6 : vector<32x1xf32> to vector<32x64xf32>
    %140 = arith.addf %138, %139 : vector<32x64xf32>
    %cst_44 = arith.constant 0.000000e+00 : f32
    %141 = vector.broadcast %cst_44 : f32 to vector<32x64xf32>
    %142 = arith.maximumf %140, %141 : vector<32x64xf32>
    %c63_i32_45 = arith.constant 63 : i32
    %143 = tpu.dynamic_rotate %142 by %c63_i32_45 dim 1 : vector<32x64xf32>, i32 -> vector<32x64xf32>
    %144 = arith.maximumf %142, %143 : vector<32x64xf32>
    %c56_i32_46 = arith.constant 56 : i32
    %145 = tpu.dynamic_rotate %144 by %c56_i32_46 dim 1 : vector<32x64xf32>, i32 -> vector<32x64xf32>
    %146 = arith.maximumf %144, %145 : vector<32x64xf32>
    %147 = arith.truncf %146 : vector<32x64xf32> to vector<32x64xbf16>
    %cst_47 = arith.constant dense<0.000000e+00> : vector<32x16xf32>
    %148 = tpu.matmul %147, %2, %cst_47 {dimension_numbers = #tpu.dot_dimension_numbers<[1], [0], [0], [1], [0, 0, 1, 1], [], []>} : vector<32x64xbf16>, vector<64x16xbf16>, vector<32x16xf32> -> vector<32x16xf32>
    %149 = arith.truncf %148 : vector<32x16xf32> to vector<32x16xbf16>
    %cst_48 = arith.constant dense<0.000000e+00> : vector<32x512xf32>
    %150 = tpu.matmul %149, %3, %cst_48 {dimension_numbers = #tpu.dot_dimension_numbers<[1], [0], [0], [1], [0, 0, 1, 1], [], []>} : vector<32x16xbf16>, vector<16x512xbf16>, vector<32x512xf32> -> vector<32x512xf32>
    %151 = tpu.iota {dimensions = array<i32: 0>} : vector<32x1xi32>
    %152 = tpu.iota {dimensions = array<i32: 1>} : vector<1x512xi32>
    %c15_i32_49 = arith.constant 15 : i32
    %153 = vector.broadcast %c15_i32_49 : i32 to vector<32x1xi32>
    %154 = arith.andi %151, %153 : vector<32x1xi32>
    %c5_i32 = arith.constant 5 : i32
    %155 = vector.broadcast %c5_i32 : i32 to vector<1x512xi32>
    %156 = arith.shrsi %152, %155 : vector<1x512xi32>
    %157 = vector.broadcast %154 : vector<32x1xi32> to vector<32x512xi32>
    %158 = vector.broadcast %156 : vector<1x512xi32> to vector<32x512xi32>
    %159 = arith.cmpi eq, %157, %158 : vector<32x512xi32>
    %cst_50 = arith.constant 0.000000e+00 : f32
    %160 = vector.broadcast %cst_50 : f32 to vector<32x512xf32>
    %161 = arith.select %159, %150, %160 : vector<32x512xi1>, vector<32x512xf32>
    %162 = tpu.iota {dimensions = array<i32: 0>} : vector<2x1xi32>
    %163 = tpu.iota {dimensions = array<i32: 1>} : vector<1x32xi32>
    %c4_i32_51 = arith.constant 4 : i32
    %164 = vector.broadcast %c4_i32_51 : i32 to vector<1x32xi32>
    %165 = arith.shrsi %163, %164 : vector<1x32xi32>
    %166 = vector.broadcast %165 : vector<1x32xi32> to vector<2x32xi32>
    %167 = vector.broadcast %162 : vector<2x1xi32> to vector<2x32xi32>
    %168 = arith.cmpi eq, %166, %167 : vector<2x32xi32>
    %cst_52 = arith.constant 1.000000e+00 : f32
    %cst_53 = arith.constant 0.000000e+00 : f32
    %169 = vector.broadcast %cst_52 : f32 to vector<2x32xf32>
    %170 = vector.broadcast %cst_53 : f32 to vector<2x32xf32>
    %171 = arith.select %168, %169, %170 : vector<2x32xi1>, vector<2x32xf32>
    %172 = arith.truncf %171 : vector<2x32xf32> to vector<2x32xbf16>
    %173 = arith.truncf %161 : vector<32x512xf32> to vector<32x512xbf16>
    %cst_54 = arith.constant dense<0.000000e+00> : vector<2x512xf32>
    %174 = tpu.matmul %172, %173, %cst_54 {dimension_numbers = #tpu.dot_dimension_numbers<[1], [0], [0], [1], [0, 0, 1, 1], [], []>} : vector<2x32xbf16>, vector<32x512xbf16>, vector<2x512xf32> -> vector<2x512xf32>
    %c256_i32 = arith.constant 256 : i32
    %175 = tpu.dynamic_rotate %174 by %c256_i32 dim 1 : vector<2x512xf32>, i32 -> vector<2x512xf32>
    %176 = arith.addf %174, %175 : vector<2x512xf32>
    %c384_i32 = arith.constant 384 : i32
    %177 = tpu.dynamic_rotate %176 by %c384_i32 dim 1 : vector<2x512xf32>, i32 -> vector<2x512xf32>
    %178 = arith.addf %176, %177 : vector<2x512xf32>
    %c448_i32 = arith.constant 448 : i32
    %179 = tpu.dynamic_rotate %178 by %c448_i32 dim 1 : vector<2x512xf32>, i32 -> vector<2x512xf32>
    %180 = arith.addf %178, %179 : vector<2x512xf32>
    %c480_i32 = arith.constant 480 : i32
    %181 = tpu.dynamic_rotate %180 by %c480_i32 dim 1 : vector<2x512xf32>, i32 -> vector<2x512xf32>
    %182 = arith.addf %180, %181 : vector<2x512xf32>
    %183 = vector.extract_strided_slice %182 {offsets = [0, 0], sizes = [2, 32], strides = [1, 1]} : vector<2x512xf32> to vector<2x32xf32>
    %184 = vector.broadcast %7 : vector<1x32xf32> to vector<2x32xf32>
    %185 = arith.addf %183, %184 : vector<2x32xf32>
    %c0_55 = arith.constant 0 : index
    %c0_56 = arith.constant 0 : index
    %186 = vector.load %arg4[%c0_55, %c0_56] : memref<2x32xf32, #tpu.memory_space<vmem>>, vector<2x32xf32>
    tpu.vector_store %arg4[%c0_55, %c0_56], %185 {strides = array<i32>} : memref<2x32xf32, #tpu.memory_space<vmem>>, vector<2x32xf32>,
    return
  }
}

</mosaic_0001>

<bundles_post_ra>
// kernel: get_feature_pallas.1
= control target key start
LH: loop header
LB: loop body
LE: loop exit
PB: predicated region body
PF: predicated region fallthrough
CT: control target
= control target key end

     0   :  { %v78_v2 = vlaneseq  ;;  %s1557_s19 = smov 15   ;;  %s1558_s20 = smov 17   ;;  %v1565_v7 = vmov 0   ;;  %s2091_s0 = inlined_call_operand.vmem [shape: f32[8,256], index: 0, kind: input, shape index: {}]   ;;  %s2092_s1 = inlined_call_operand.vmem [shape: bf16[128,512], index: 1, kind: input, shape index: {}]   ;;  %s2093_s2 = inlined_call_operand.vmem [shape: bf16[256,64], index: 2, kind: input, shape index: {}]   ;;  %s2094_s3 = inlined_call_operand.vmem [shape: f32[56,32], index: 3, kind: input, shape index: {}]   ;;  %s2095_s4 = inlined_call_operand.hbm [shape: f32[2,32], index: 4, kind: output, shape index: {}]  }
   0x1   :  { %v1606_v0 = vld [vmem:[%s2091_s0] sm:$0xff]  ;;  %v1611_v1 = vld [vmem:[%s2091_s0 + $0x8] sm:$0xff]  ;;  %s1559_s21 = smov 1   ;;  %s1560_s22 = smov 16   ;;  %273 = vmatprep.mubr.bf16.mxu0 %v1565_v7  ;;  %1368 = vset.pattern.permute.xlu0 %v1565_v7 }
   0x2   :  { %v1338_v3 = vpack.i.bf16 %v1611_v1, %v1606_v0  ;;  %v1615_v4 = vand.u32 127, %v78_v2  ;;  %v1620_v6 = vshrl.u32 %v78_v2, 7  ;;  %s1561_s0 = smov 127   ;;  %s1562_s23 = smov 113   ;;  %1369 = vset.pattern.permute.xlu1 %v1565_v7  ;;  %v69_v8 = vld [vmem:[%s2094_s3] sm:$0xff]  ;;  %v70_v9 = vld [vmem:[%s2094_s3 + $0x8] sm:$0xff] }
   0x3   :  { %s1563_s24 = smov 112   ;;  %s1564_s25 = smov 111  }
   0x4   :  { %1339 = vrot.lane.b32.xlu1 %v1338_v3, %s1557_s19  ;;  %1329 = vrot.lane.b32.xlu0 %v1338_v3, %s1558_s20  ;;  %v1618_v5 = vshra.s32 %v1615_v4, 4 }
   0x8   :  { %1344 = vrot.lane.b32.xlu1 %v1338_v3, %s1559_s21  ;;  %1334 = vrot.lane.b32.xlu0 %v1338_v3, %s1560_s22 }
   0xc   :  { %1349 = vrot.lane.b32.xlu0 %v1338_v3, %s1561_s0  ;;  %1354 = vrot.lane.b32.xlu1 %v1338_v3, %s1562_s23 }
  0x10   :  { %1359 = vrot.lane.b32.xlu0 %v1338_v3, %s1563_s24  ;;  %1364 = vrot.lane.b32.xlu1 %v1338_v3, %s1564_s25 }
  0x14   :  { %217 = vperm.xlu0 %1368, %v69_v8   ;;  %222 = vperm.xlu1 %1369, %v70_v9  }
  0x15   :  { %9 = vsyncpa [#allocation3], 0  ;;  %v1636_v10 = vadd.s32 128, %v1615_v4  ;;  %v83_v13 = vand.u32 15, %v1615_v4  ;;  %vm85_vm3 = vcmp.ge.s32.totalorder %v1618_v5, 1  ;;  %vm125_vm6 = vcmp.lt.s32.totalorder %v1615_v4, 15 }
  0x16   :  { %vm140_vm7 = vcmp.lt.s32.totalorder %v1615_v4, 1  ;;  %vm97_vm8 = vcmp.lt.s32.totalorder %v1615_v4, 17  ;;  %vm112_vm10 = vcmp.lt.s32.totalorder %v1615_v4, 16  ;;  %vm2096_vm11 = vcmp.lt.s32.totalorder %v1615_v4, 127  ;;  %v1503_v32 = vld [vmem:[%s2093_s2 + $0x48] sm:$0xff]   ;;  %v1505_v40 = vld [vmem:[%s2093_s2 + $0x50] sm:$0xff]  }
  0x17   :  { %v82_v11 = vshra.s32 %v1636_v10, 4  ;;  %v84_v12 = vand.u32 15, %v1636_v10  ;;  %vm1650_vm4 = vcmp.ge.s32.totalorder %v83_v13, 1  ;;  %vm1676_vm14 = vcmp.le.s32.totalorder %v83_v13, 14  ;;  %v1514_v49 = vld [vmem:[%s2093_s2 + $0x30] sm:$0xff]   ;;  %s1569_s13 = smov 73  }
  0x18   :  { %vm1671_vm12 = vmand %vm85_vm3, %vm1650_vm4  ;;  %s1570_s14 = smov 65   ;;  %s1571_s15 = smov 71  }
  0x19   :  { %vm1641_vm1 = vcmp.ge.s32.totalorder %v82_v11, 1  ;;  %vm1645_vm2 = vcmp.ge.s32.totalorder %v84_v12, 1  ;;  %vm1661_vm9 = vcmp.le.s32.totalorder %v84_v12, 14  ;;  %vm1699_vm13 = vcmp.le.s32.totalorder %v82_v11, 14  ;;  %s1572_s16 = smov 121   ;;  %s1573_s17 = smov 119  }
  0x1a   :  { %vm101_vm5 = vmand %vm1641_vm1, %vm1645_vm2  ;;  %s1574_s18 = smov 120   ;;  %s1577_s27 = smov [#allocation2]  }
  0x1b   :  { %vm1687_vm15 = vmpackc.low %vm1641_vm1, %vm101_vm5  ;;  %s1141_s28 = sshll.u32 %s1577_s27, 4  ;;  %s1142_s28 = int_to_ptr.vmem [resolvable:$true] %s1141_s28 }
  0x1c   :  { %vm129_vm0 = vmand %vm1641_vm1, %vm1661_vm9  ;;  %vm1566_vm1 = vmmov 1   ;;  %s1533_s29 = scalar_lea.vmem %s1142_s28, 32  ;;  %p1538_p1 = scmp.lt.s32.totalorder %s1142_s28, %s1142_s28 }
  0x1d   :  { %vm1715_vm5 = vmand %vm85_vm3, %vm1676_vm14  ;;  %p1534_p0 = scmp.ne.s32.totalorder %s1142_s28, %s1533_s29  ;;  %p1539_p2 = scmp.lt.s32.totalorder %s1533_s29, %s1533_s29 }
  0x1f   :  { %p1540_p3 = por %p1539_p2, %p1538_p1 }
  0x21   :  { %p1541_p4 = pnand %p1540_p3, %p1534_p0 }
  0x76   :  { %v1340_v16 = vpop.permute.xlu1 %1339  ;;  %v1330_v17 = vpop.permute.xlu0 %1329 }
  0x77   :  { %v1342_v19 = vunpack.i.h.bf16 %v1340_v16  ;;  %v1341_v20 = vunpack.i.l.bf16 %v1340_v16  ;;  %v1332_v21 = vunpack.i.h.bf16 %v1330_v17  ;;  %v1331_v22 = vunpack.i.l.bf16 %v1330_v17 }
  0x79   :  { %v126_v33 = vsel %vm125_vm6, %v1341_v20, %v1342_v19  ;;  %v98_v34 = vsel %vm97_vm8, %v1331_v22, %v1332_v21  ;;  %v99_v38 = vsel %vm97_vm8, %v1332_v21, %v1331_v22  ;;  %v127_v41 = vsel %vm125_vm6, %v1342_v19, %v1341_v20  ;;  %vm1153_vm8 = vmpackc.low %vm85_vm3, %vm1671_vm12  ;;  %v1500_v19 = vld [vmem:[%s2092_s1] ss:$16 sps:$4 sm:$0xff]  }
  0x7a   :  { %v1345_v24 = vpop.permute.xlu1 %1344  ;;  %v1335_v25 = vpop.permute.xlu0 %1334  ;;  %vm1734_vm6 = vmpackc.low %vm1645_vm2, %vm129_vm0  ;;  %vm181_vm0 = vcmp.lt.s32.totalorder %v1615_v4, 112  ;;  %vm87_vm12 = vcmp.le.s32.totalorder %v1618_v5, 14 }
  0x7b   :  { %v1347_v28 = vunpack.i.h.bf16 %v1345_v24  ;;  %v1346_v29 = vunpack.i.l.bf16 %v1345_v24  ;;  %v1337_v30 = vunpack.i.h.bf16 %v1335_v25  ;;  %v1336_v31 = vunpack.i.l.bf16 %v1335_v25  ;;  %vm1159_vm3 = vmpackc.low %vm1650_vm4, %vm1715_vm5 }
  0x7d   :  { %v141_v36 = vsel %vm140_vm7, %v1346_v29, %v1347_v28  ;;  %v113_v37 = vsel %vm112_vm10, %v1336_v31, %v1337_v30  ;;  %v114_v39 = vsel %vm112_vm10, %v1337_v30, %v1336_v31  ;;  %v142_v42 = vsel %vm140_vm7, %v1347_v28, %v1346_v29  ;;  %vm1750_vm7 = vmpackc.low %vm1661_vm9, %vm1566_vm1  ;;  %v1501_v30 = vld [vmem:[%s2093_s2 + $0x40] sm:$0xff]  }
  0x7e   :  { %v1151_v43 = vpack.c.bf16 %v113_v37, %v98_v34  ;;  %v1350_v44 = vpop.permute.xlu0 %1349  ;;  %v1154_v45 = vpack.c.bf16 %v114_v39, %v99_v38  ;;  %v1355_v46 = vpop.permute.xlu1 %1354  ;;  %v1157_v52 = vpack.c.bf16 %v141_v36, %v126_v33  ;;  %vm194_vm10 = vcmp.lt.s32.totalorder %v1615_v4, 111  ;;  %v1502_v31 = vld [vmem:[%s2093_s2] sm:$0xff]   ;;  %1263 = vmatprep.subr.bf16.mxu1 %v1501_v30  ;;  %v1504_v38 = vld [vmem:[%s2093_s2 + $0x8] sm:$0xff]  }
  0x7f   :  { %v1352_v47 = vunpack.i.h.bf16 %v1350_v44  ;;  %v1351_v48 = vunpack.i.l.bf16 %v1350_v44  ;;  %v1357_v50 = vunpack.i.h.bf16 %v1355_v46  ;;  %v1356_v51 = vunpack.i.l.bf16 %v1355_v46  ;;  %1264 = vmatpush3.bf16.msra.mxu1 %v1502_v31  ;;  %v1509_v44 = vld [vmem:[%s2093_s2 + $0x60] sm:$0xff]   ;;  %v1511_v46 = vld [vmem:[%s2093_s2 + $0x68] sm:$0xff]  }
  0x80   :  { %1152 = vmatprep.subr.msk.bf16.mxu0 %vm1687_vm15, %v1151_v43  ;;  %v1160_v55 = vpack.c.bf16 %v142_v42, %v127_v41  ;;  %vm2119_vm15 = vcmp.lt.s32.totalorder %v1615_v4, 113  ;;  %1265 = vmatprep.subr.bf16.mxu1 %v1503_v32  ;;  %v1506_v41 = vld [vmem:[%s2093_s2 + $0x10] sm:$0xff]   ;;  %v1507_v42 = vld [vmem:[%s2093_s2 + $0x58] sm:$0xff]  }
  0x81   :  { %v155_v53 = vsel %vm2096_vm11, %v1352_v47, %v1351_v48  ;;  %1155 = vmatpush1.bf16.msk.msra.mxu0 %vm1153_vm8, %v1154_v45  ;;  %v154_v56 = vsel %vm2096_vm11, %v1351_v48, %v1352_v47  ;;  %v168_v58 = vsel %vm2119_vm15, %v1357_v50, %v1356_v51  ;;  %vm170_vm8 = vmand %vm1699_vm13, %vm1645_vm2  ;;  %v1508_v43 = vld [vmem:[%s2093_s2 + $0x18] sm:$0xff]   ;;  %v1510_v45 = vld [vmem:[%s2093_s2 + $0x20] sm:$0xff]  }
  0x82   :  { %v1163_v57 = vpack.c.bf16 %v155_v53, %v1611_v1  ;;  %1158 = vmatprep.subr.msk.bf16.mxu0 %vm1734_vm6, %v1157_v52  ;;  %v1360_v59 = vpop.permute.xlu0 %1359  ;;  %v1365_v60 = vpop.permute.xlu1 %1364  ;;  %vm198_vm11 = vmand %vm1699_vm13, %vm1661_vm9  ;;  %v1166_v1 = vpack.c.bf16 %v154_v56, %v1606_v0  ;;  %v1512_v47 = vld [vmem:[%s2093_s2 + $0x28] sm:$0xff]   ;;  %v1513_v48 = vld [vmem:[%s2093_s2 + $0x70] sm:$0xff]  }
  0x83   :  { %v1362_v61 = vunpack.i.h.bf16 %v1360_v59  ;;  %v1361_v62 = vunpack.i.l.bf16 %v1360_v59  ;;  %v1367_v63 = vunpack.i.h.bf16 %v1365_v60  ;;  %v1366_v2 = vunpack.i.l.bf16 %v1365_v60  ;;  %vm197_vm6 = vmand %vm87_vm12, %vm1676_vm14  ;;  %1266 = vmatpush3.bf16.msra.mxu1 %v1504_v38 }
  0x84   :  { %vm1165_vm9 = vmpackc.low %vm1676_vm14, %vm1566_vm1  ;;  %1267 = vmatprep.subr.bf16.mxu1 %v1505_v40 }
  0x85   :  { %v183_v3 = vsel %vm181_vm0, %v1362_v61, %v1361_v62  ;;  %1161 = vmatpush1.bf16.msk.msra.mxu0 %vm1159_vm3, %v1160_v55  ;;  %v196_v8 = vsel %vm194_vm10, %v1367_v63, %v1366_v2  ;;  %v195_v9 = vsel %vm194_vm10, %v1366_v2, %v1367_v63  ;;  %vm1168_vm5 = vmpackc.low %vm1699_vm13, %vm170_vm8  ;;  %v182_v14 = vsel %vm181_vm0, %v1361_v62, %v1362_v61 }
  0x86   :  { %v1169_v0 = vpack.c.bf16 %v183_v3, %v168_v58  ;;  %1164 = vmatprep.subr.msk.bf16.mxu0 %vm1750_vm7, %v1163_v57  ;;  %vm169_vm14 = vmand %vm87_vm12, %vm1650_vm4  ;;  %v204_v11 = vsel %vm198_vm11, %v196_v8, 0.0  ;;  %v203_v12 = vsel %vm197_vm6, %v195_v9, 0.0  ;;  %vm234_vm13 = vcmask 1043456  }
  0x87   :  { %vm2120_vm3 = vmmov %vm2119_vm15  ;;  %v214_v15 = vpack.c.bf16 %v204_v11, %v204_v11  ;;  %v213_v16 = vpack.c.bf16 %v203_v12, %v203_v12  ;;  %vm230_vm4 = vcmask 588800   ;;  %1268 = vmatpush3.bf16.msra.mxu1 %v1506_v41  ;;  %vm2121_vm11 = vcmp.lt.s32.totalorder %v1615_v4, 127 }
  0x88   :  { %v167_v13 = vsel %vm2120_vm3, %v1356_v51, %v1357_v50  ;;  %vm1171_vm2 = vmpackc.low %vm87_vm12, %vm169_vm14  ;;  %1269 = vmatprep.subr.bf16.mxu1 %v1507_v42  ;;  %v1515_v50 = vld [vmem:[%s2093_s2 + $0x78] sm:$0xff]   ;;  %vm611_vm12 = vcmask 130048  }
  0x89   :  { %1167 = vmatpush1.bf16.msk.msra.mxu0 %vm1165_vm9, %v1166_v1  ;;  %v1172_v17 = vpack.c.bf16 %v182_v14, %v167_v13  ;;  %v236_v18 = vsel %vm234_vm13, %v213_v16, 0  ;;  %v1516_v51 = vld [vmem:[%s2093_s2 + $0x38] sm:$0xff]   ;;  %vm2122_vm1 = vmmov %vm2121_vm11  ;;  %s1567_s2 = smov 64  }
  0x8a   :  { %1170 = vmatprep.subr.msk.bf16.mxu0 %vm1168_vm5, %v1169_v0  ;;  %vm2123_vm7 = vmmov %vm2122_vm1 }
  0x8b   :  { %1270 = vmatpush3.bf16.msra.mxu1 %v1508_v43  ;;  %vm2124_vm10 = vmmov %vm2122_vm1 }
  0x8c   :  { %1271 = vmatprep.subr.bf16.mxu1 %v1509_v44  ;;  %v72_v44 = vld [vmem:[%s2094_s3 + $0x18] sm:$0xff] }
  0x8d   :  { %1173 = vmatpush1.bf16.msk.msra.mxu0 %vm1171_vm2, %v1172_v17 }
  0x8e   :  { %1174 = vmatprep.subr.msk.bf16.mxu0 %vm234_vm13, %v214_v15 }
  0x8f   :  { %1272 = vmatpush3.bf16.msra.mxu1 %v1510_v45  ;;  %v71_v45 = vld [vmem:[%s2094_s3 + $0x10] sm:$0xff] }
  0x90   :  { %1273 = vmatprep.subr.bf16.mxu1 %v1511_v46  ;;  %v74_v46 = vld [vmem:[%s2094_s3 + $0x28] sm:$0xff] }
  0x91   :  { %250 = vmatpush1.bf16.msra.mxu0 %v236_v18 }
  0x92   :  { %618 = vmatprep.subr.bf16.mxu0 %v1565_v7 }
  0x93   :  { %v218_v20 = vpop.permute.xlu0 %217  ;;  %v223_v22 = vpop.permute.xlu1 %222  ;;  %1274 = vmatpush3.bf16.msra.mxu1 %v1512_v47  ;;  %v73_v47 = vld [vmem:[%s2094_s3 + $0x20] sm:$0xff] }
  0x94   :  { %1175 = vmatmul.mubr.msk.bf16.vlgmr.msra.gmra.mrb[0].mxu0 %vm230_vm4, %v1500_v19  ;;  %1275 = vmatprep.subr.bf16.mxu1 %v1513_v48  ;;  %v1517_v48 = vld [vmem:[%s2092_s1 + $0x24] ss:$16 sps:$4 sm:$0xff]  }
  0x95   :  { %1220 = vmatprep.mubr.msk.bf16.mxu0 %vm611_vm12, %v1517_v48 }
  0x97   :  { %1276 = vmatpush3.bf16.msra.mxu1 %v1514_v49  ;;  %v459_v49 = vshra.s32 %v1615_v4, 3 }
  0x98   :  { %1277 = vmatprep.subr.bf16.mxu1 %v1515_v50  ;;  %v460_v50 = vand.u32 7, %v1615_v4 }
  0x99   :  { %vm1917_vm15 = vcmp.ge.s32.totalorder %v459_v49, 1  ;;  %vm1949_vm4 = vcmp.le.s32.totalorder %v459_v49, 6 }
  0x9a   :  { %vm1921_vm8 = vcmp.ge.s32.totalorder %v460_v50, 1  ;;  %vm1929_vm5 = vcmp.le.s32.totalorder %v460_v50, 6  ;;  %vm1199_vm14 = vmpackc.low %vm1917_vm15, %vm1917_vm15 }
  0x9b   :  { %1278 = vmatpush3.bf16.msra.mxu1 %v1516_v51  ;;  %vm478_vm6 = vmand %vm1917_vm15, %vm1921_vm8 }
  0x9c   :  { %vm1196_vm9 = vmpackc.low %vm478_vm6, %vm478_vm6  ;;  %vm785_vm6 = vcmask 523264  }
  0x9d   :  { %vm501_vm3 = vmand %vm1917_vm15, %vm1929_vm5 }
  0x9e   :  { %vm1202_vm2 = vmpackc.low %vm501_vm3, %vm501_vm3 }
  0x9f   :  { %vm1205_vm13 = vmpackc.low %vm1921_vm8, %vm1921_vm8 }
  0xa0   :  { %vm553_vm15 = vmand %vm1949_vm4, %vm1929_vm5 }
 0x167   :  { %v275_v21 = vpop.f32.mrb[0].mxu0 }
 0x168   :  { %v276_v23 = vadd.f32 %v275_v21, %v218_v20  ;;  %v277_v24 = vpop.f32.mrb[1].mxu0 }
 0x169   :  { %v278_v25 = vadd.f32 %v277_v24, %v218_v20  ;;  %v279_v26 = vpop.f32.mrb[2].mxu0 }
 0x16a   :  { %v280_v27 = vadd.f32 %v279_v26, %v223_v22  ;;  %v281_v28 = vpop.f32.mrb[3].mxu0  ;;  %v284_v33 = vmax.f32 %v276_v23, 0.0 }
 0x16b   :  { %v282_v29 = vadd.f32 %v281_v28, %v223_v22  ;;  %v285_v35 = vmax.f32 %v278_v25, 0.0 }
 0x16c   :  { %v286_v34 = vmax.f32 %v280_v27, 0.0 }
 0x16d   :  { %v287_v36 = vmax.f32 %v282_v29, 0.0 }
 0x16e   :  { %v1370_v37 = vpack.i.bf16 %v286_v34, %v284_v33 }
 0x16f   :  { %v1375_v39 = vpack.i.bf16 %v287_v36, %v285_v35 }
 0x170   :  { %1371 = vrot.lane.b32.xlu1 %v1370_v37, %s1561_s0 }
 0x171   :  { %1376 = vrot.lane.b32.xlu0 %v1375_v39, %s1561_s0 }
 0x1e2   :  { %v1372_v52 = vpop.permute.xlu1 %1371 }
 0x1e3   :  { %v1374_v53 = vunpack.i.h.bf16 %v1372_v52  ;;  %v1373_v54 = vunpack.i.l.bf16 %v1372_v52  ;;  %v1377_v55 = vpop.permute.xlu0 %1376 }
 0x1e4   :  { %v1379_v56 = vunpack.i.h.bf16 %v1377_v55  ;;  %v1378_v57 = vunpack.i.l.bf16 %v1377_v55 }
 0x1e6   :  { %v296_v58 = vsel %vm2121_vm11, %v1373_v54, %v1378_v57  ;;  %v297_v59 = vsel %vm2122_vm1, %v1374_v53, %v1379_v56  ;;  %v298_v60 = vsel %vm2123_vm7, %v1378_v57, %v1373_v54  ;;  %v299_v61 = vsel %vm2124_vm10, %v1379_v56, %v1374_v53  ;;  %vm1208_vm11 = vmpackc.low %vm1929_vm5, %vm1929_vm5 }
 0x1e7   :  { %v301_v62 = vmax.f32 %v285_v35, %v298_v60  ;;  %v303_v63 = vmax.f32 %v287_v36, %v299_v61  ;;  %v300_v2 = vmax.f32 %v284_v33, %v296_v58  ;;  %v302_v1 = vmax.f32 %v286_v34, %v297_v59  ;;  %vm532_vm1 = vmand %vm1949_vm4, %vm1921_vm8 }
 0x1e8   :  { %vm1211_vm7 = vmpackc.low %vm532_vm1, %vm532_vm1 }
 0x1e9   :  { %v1385_v3 = vpack.i.bf16 %v303_v63, %v301_v62  ;;  %v1380_v8 = vpack.i.bf16 %v302_v1, %v300_v2  ;;  %vm1214_vm10 = vmpackc.low %vm1949_vm4, %vm1949_vm4 }
 0x1ea   :  { %vm1217_vm8 = vmpackc.low %vm553_vm15, %vm553_vm15 }
 0x1eb   :  { %1386 = vrot.lane.b32.xlu0 %v1385_v3, %s1563_s24  ;;  %1381 = vrot.lane.b32.xlu1 %v1380_v8, %s1563_s24  ;;  %s1568_s24 = smov 72  }
 0x25d   :  { %v1387_v9 = vpop.permute.xlu0 %1386  ;;  %v1382_v0 = vpop.permute.xlu1 %1381 }
 0x25e   :  { %v1389_v11 = vunpack.i.h.bf16 %v1387_v9  ;;  %v1388_v12 = vunpack.i.l.bf16 %v1387_v9  ;;  %v1384_v13 = vunpack.i.h.bf16 %v1382_v0  ;;  %v1383_v14 = vunpack.i.l.bf16 %v1382_v0 }
 0x260   :  { %v313_v15 = vsel %vm181_vm0, %v1384_v13, %v1389_v11  ;;  %v312_v16 = vsel %vm181_vm0, %v1383_v14, %v1388_v12  ;;  %v314_v17 = vsel %vm181_vm0, %v1388_v12, %v1383_v14  ;;  %v315_v18 = vsel %vm181_vm0, %v1389_v11, %v1384_v13 }
 0x261   :  { %v317_v19 = vmax.f32 %v301_v62, %v314_v17  ;;  %v319_v20 = vmax.f32 %v303_v63, %v315_v18  ;;  %v316_v21 = vmax.f32 %v300_v2, %v312_v16  ;;  %v318_v22 = vmax.f32 %v302_v1, %v313_v15 }
 0x262   :  { %vm465_vm0 = vcmask 1048064  }
 0x263   :  { %v321_v23 = vpack.c.bf16 %v319_v20, %v317_v19  ;;  %v320_v24 = vpack.c.bf16 %v318_v22, %v316_v21 }
 0x265   :  { %450 = vmatprep.mubr.bf16.mxu1 %v321_v23 }
 0x266   :  { %451 = vmatmul.mubr.bf16.vlgmr.msra.gmra.mrb[0].mxu1 %v320_v24 }
 0x339   :  { %v1279_v25 = vpop.f32.mrb[0].mxu1 }
 0x33a   :  { %v1280_v26 = vpop.f32.mrb[1].mxu1 }
 0x33b   :  { %v1881_v27 = vadd.f32 %v1280_v26, %v1279_v25  ;;  %v1282_v28 = vpop.f32.mrb[2].mxu1 }
 0x33c   :  { %v1283_v29 = vpop.f32.mrb[3].mxu1 }
 0x33d   :  { %v1883_v30 = vadd.f32 %v1283_v29, %v1282_v28  ;;  %v1519_v29 = vld [vmem:[%s2092_s1 + $0x20] ss:$16 sps:$4 sm:$0xff]  }
 0x33f   :  { %v1390_v31 = vpack.i.bf16 %v1883_v30, %v1881_v27  ;;  %v568_v14 = vpack.c.bf16 %v1883_v30, %v1881_v27 }
 0x341   :  { %1391 = vrot.lane.b32.xlu1 %v1390_v31, %s1567_s2  ;;  %v1522_v31 = vld [vmem:[%s2092_s1 + $0x40] ss:$16 sps:$4 sm:$0xff]  }
 0x3b3   :  { %v1392_v32 = vpop.permute.xlu1 %1391 }
 0x3b4   :  { %v1394_v33 = vunpack.i.h.bf16 %v1392_v32  ;;  %v1393_v34 = vunpack.i.l.bf16 %v1392_v32 }
 0x3b6   :  { %v468_v35 = vsel %vm465_vm0, %v1393_v34, %v1881_v27  ;;  %v471_v36 = vsel %vm465_vm0, %v1394_v33, %v1883_v30 }
 0x3b7   :  { %v1395_v37 = vpack.i.bf16 %v471_v36, %v468_v35 }
 0x3b9   :  { %1396 = vrot.lane.b32.xlu0 %v1395_v37, %s1567_s2 }
 0x42b   :  { %v1397_v38 = vpop.permute.xlu0 %1396 }
 0x42c   :  { %v1399_v39 = vunpack.i.h.bf16 %v1397_v38  ;;  %v1398_v40 = vunpack.i.l.bf16 %v1397_v38 }
 0x42e   :  { %v477_v41 = vsel %vm465_vm0, %v1399_v39, %v1883_v30  ;;  %v476_v42 = vsel %vm465_vm0, %v1398_v40, %v1881_v27  ;;  %v1520_v30 = vld [vmem:[%s2092_s1 + $0x44] ss:$16 sps:$4 sm:$0xff]  }
 0x42f   :  { %v1405_v43 = vpack.i.bf16 %v477_v41, %v476_v42 }
 0x431   :  { %1406 = vrot.lane.b32.xlu0 %v1405_v43, %s1568_s24  ;;  %1401 = vrot.lane.b32.xlu1 %v1405_v43, %s1569_s13 }
 0x435   :  { %1416 = vrot.lane.b32.xlu0 %v1405_v43, %s1570_s14  ;;  %1411 = vrot.lane.b32.xlu1 %v1405_v43, %s1571_s15 }
 0x439   :  { %1426 = vrot.lane.b32.xlu0 %v1405_v43, %s1572_s16  ;;  %1421 = vrot.lane.b32.xlu1 %v1405_v43, %s1561_s0 }
 0x43d   :  { %1436 = vrot.lane.b32.xlu0 %v1405_v43, %s1573_s17  ;;  %1431 = vrot.lane.b32.xlu1 %v1405_v43, %s1574_s18 }
 0x441   :  { %580 = vperm.xlu0 %1368, %v72_v44   ;;  %575 = vperm.xlu1 %1369, %v71_v45  }
 0x445   :  { %590 = vperm.xlu0 %1368, %v74_v46   ;;  %585 = vperm.xlu1 %1369, %v73_v47  }
 0x4a3   :  { %v1407_v53 = vpop.permute.xlu0 %1406  ;;  %v1402_v54 = vpop.permute.xlu1 %1401 }
 0x4a4   :  { %v1404_v55 = vunpack.i.h.bf16 %v1402_v54  ;;  %v1403_v56 = vunpack.i.l.bf16 %v1402_v54  ;;  %v1409_v57 = vunpack.i.h.bf16 %v1407_v53  ;;  %v1408_v58 = vunpack.i.l.bf16 %v1407_v53 }
 0x4a6   :  { %v1197_v59 = vpack.c.bf16 %v1404_v55, %v1403_v56  ;;  %v1200_v62 = vpack.c.bf16 %v1409_v57, %v1408_v58 }
 0x4a7   :  { %v1412_v60 = vpop.permute.xlu1 %1411  ;;  %v1417_v1 = vpop.permute.xlu0 %1416 }
 0x4a8   :  { %1198 = vmatpush1.bf16.msk.msra.mxu0 %vm1196_vm9, %v1197_v59  ;;  %v1414_v63 = vunpack.i.h.bf16 %v1412_v60  ;;  %v1413_v2 = vunpack.i.l.bf16 %v1412_v60  ;;  %v1419_v3 = vunpack.i.h.bf16 %v1417_v1  ;;  %v1418_v8 = vunpack.i.l.bf16 %v1417_v1 }
 0x4a9   :  { %620 = vmatprep.subr.bf16.mxu0 %v1565_v7 }
 0x4aa   :  { %v1203_v9 = vpack.c.bf16 %v1414_v63, %v1413_v2  ;;  %v1206_v0 = vpack.c.bf16 %v1419_v3, %v1418_v8 }
 0x4ab   :  { %v1422_v11 = vpop.permute.xlu1 %1421  ;;  %v1427_v15 = vpop.permute.xlu0 %1426 }
 0x4ac   :  { %1201 = vmatpush1.bf16.msk.msra.mxu0 %vm1199_vm14, %v1200_v62  ;;  %v1424_v12 = vunpack.i.h.bf16 %v1422_v11  ;;  %v1423_v13 = vunpack.i.l.bf16 %v1422_v11  ;;  %v1429_v17 = vunpack.i.h.bf16 %v1427_v15  ;;  %v1428_v18 = vunpack.i.l.bf16 %v1427_v15 }
 0x4ad   :  { %622 = vmatprep.subr.bf16.mxu0 %v1565_v7 }
 0x4ae   :  { %v1209_v19 = vpack.c.bf16 %v1424_v12, %v1423_v13  ;;  %v1212_v21 = vpack.c.bf16 %v1429_v17, %v1428_v18 }
 0x4af   :  { %v1432_v20 = vpop.permute.xlu1 %1431  ;;  %v1437_v24 = vpop.permute.xlu0 %1436 }
 0x4b0   :  { %1204 = vmatpush1.bf16.msk.msra.mxu0 %vm1202_vm2, %v1203_v9  ;;  %v1434_v22 = vunpack.i.h.bf16 %v1432_v20  ;;  %v1433_v23 = vunpack.i.l.bf16 %v1432_v20  ;;  %v1439_v25 = vunpack.i.h.bf16 %v1437_v24  ;;  %v1438_v26 = vunpack.i.l.bf16 %v1437_v24 }
 0x4b1   :  { %624 = vmatprep.subr.bf16.mxu0 %v1565_v7 }
 0x4b2   :  { %v1215_v27 = vpack.c.bf16 %v1434_v22, %v1433_v23  ;;  %v1218_v28 = vpack.c.bf16 %v1439_v25, %v1438_v26 }
 0x4b4   :  { %1207 = vmatpush1.bf16.msk.msra.mxu0 %vm1205_vm13, %v1206_v0 }
 0x4b5   :  { %626 = vmatprep.subr.bf16.mxu0 %v1565_v7 }
 0x4b8   :  { %627 = vmatpush1.bf16.msra.mxu0 %v568_v14 }
 0x4b9   :  { %628 = vmatprep.subr.bf16.mxu0 %v1565_v7 }
 0x4bc   :  { %1210 = vmatpush1.bf16.msk.msra.mxu0 %vm1208_vm11, %v1209_v19 }
 0x4bd   :  { %630 = vmatprep.subr.bf16.mxu0 %v1565_v7 }
 0x4c0   :  { %1213 = vmatpush1.bf16.msk.msra.mxu0 %vm1211_vm7, %v1212_v21  ;;  %v576_v32 = vpop.permute.xlu1 %575  ;;  %v581_v36 = vpop.permute.xlu0 %580 }
 0x4c1   :  { %632 = vmatprep.subr.bf16.mxu0 %v1565_v7 }
 0x4c4   :  { %1216 = vmatpush1.bf16.msk.msra.mxu0 %vm1214_vm10, %v1215_v27  ;;  %v586_v43 = vpop.permute.xlu1 %585  ;;  %v591_v47 = vpop.permute.xlu0 %590  ;;  %vm2133_vm10 = vcmp.eq.s32.totalorder %v1618_v5, %v1620_v6 }
 0x4c5   :  { %634 = vmatprep.subr.bf16.mxu0 %v1565_v7 }
 0x4c8   :  { %1219 = vmatpush1.bf16.msk.msra.mxu0 %vm1217_vm8, %v1218_v28 }
 0x4cb   :  { %651 = vmatmul.mubr.bf16.vlgmr.msra.gmra.mrb[4].mxu0 %v1519_v29 }
 0x4cc   :  { %1221 = vmatprep.mubr.msk.bf16.mxu0 %vm611_vm12, %v1520_v30 }
 0x4d3   :  { %659 = vmatmul.mubr.bf16.gmra.mrb[8].mxu0 %v1522_v31 }
 0x4d4   :  { %954 = vmatprep.mubr.bf16.mxu0 %v1565_v7 }
 0x59e   :  { %v652_v33 = vpop.f32.mrb[4].mxu0 }
 0x59f   :  { %v653_v34 = vadd.f32 %v652_v33, %v576_v32  ;;  %v654_v35 = vpop.f32.mrb[5].mxu0 }
 0x5a0   :  { %v655_v37 = vpop.f32.mrb[6].mxu0 }
 0x5a1   :  { %v656_v38 = vadd.f32 %v655_v37, %v581_v36  ;;  %v657_v39 = vpop.f32.mrb[7].mxu0  ;;  %v667_v40 = vmax.f32 %v653_v34, 0.0  ;;  %v1523_v37 = vld [vmem:[%s2092_s1 + $0x60] ss:$16 sps:$4 sm:$0xff]  }
 0x5a2   :  { %1291 = vmatprep.subr.bf16.mxu1 %v1523_v37 }
 0x5a3   :  { %v668_v41 = vmax.f32 %v656_v38, 0.0  ;;  %1292 = vmatpush3.bf16.msra.mxu1 %v1523_v37 }
 0x5a5   :  { %v1440_v42 = vpack.i.bf16 %v668_v41, %v667_v40 }
 0x5a6   :  { %v660_v44 = vpop.f32.mrb[8].mxu0 }
 0x5a7   :  { %v661_v45 = vadd.f32 %v660_v44, %v586_v43  ;;  %v662_v46 = vpop.f32.mrb[9].mxu0  ;;  %1441 = vrot.lane.b32.xlu1 %v1440_v42, %s1567_s2  ;;  %v1524_v44 = vld [vmem:[%s2092_s1 + $0x80] ss:$16 sps:$4 sm:$0xff]  }
 0x5a8   :  { %v663_v48 = vpop.f32.mrb[10].mxu0  ;;  %1293 = vmatprep.subr.bf16.mxu1 %v1524_v44 }
 0x5a9   :  { %v664_v49 = vadd.f32 %v663_v48, %v591_v47  ;;  %v665_v50 = vpop.f32.mrb[11].mxu0  ;;  %v669_v51 = vmax.f32 %v661_v45, 0.0  ;;  %1294 = vmatpush3.bf16.msra.mxu1 %v1524_v44  ;;  %v1525_v45 = vld [vmem:[%s2092_s1 + $0xa0] ss:$16 sps:$4 sm:$0xff]  }
 0x5aa   :  { %1295 = vmatprep.subr.bf16.mxu1 %v1525_v45 }
 0x5ab   :  { %v670_v52 = vmax.f32 %v664_v49, 0.0  ;;  %v1526_v49 = vld [vmem:[%s2092_s1 + $0xc0] ss:$16 sps:$4 sm:$0xff]  }
 0x5ad   :  { %v1445_v53 = vpack.i.bf16 %v670_v52, %v669_v51  ;;  %1296 = vmatpush3.bf16.msra.mxu1 %v1525_v45 }
 0x5ae   :  { %1297 = vmatprep.subr.bf16.mxu1 %v1526_v49 }
 0x5af   :  { %1446 = vrot.lane.b32.xlu0 %v1445_v53, %s1567_s2 }
 0x5b1   :  { %1298 = vmatpush3.bf16.msra.mxu1 %v1526_v49 }
 0x619   :  { %v1442_v54 = vpop.permute.xlu1 %1441 }
 0x61a   :  { %v1444_v55 = vunpack.i.h.bf16 %v1442_v54  ;;  %v1443_v56 = vunpack.i.l.bf16 %v1442_v54 }
 0x61c   :  { %v673_v57 = vsel %vm465_vm0, %v1443_v56, %v667_v40  ;;  %v676_v58 = vsel %vm465_vm0, %v1444_v55, %v668_v41 }
 0x61d   :  { %v1450_v59 = vpack.i.bf16 %v676_v58, %v673_v57 }
 0x61f   :  { %1451 = vrot.lane.b32.xlu1 %v1450_v59, %s1567_s2 }
 0x621   :  { %v1447_v60 = vpop.permute.xlu0 %1446 }
 0x622   :  { %v1449_v61 = vunpack.i.h.bf16 %v1447_v60  ;;  %v1448_v62 = vunpack.i.l.bf16 %v1447_v60 }
 0x624   :  { %v679_v63 = vsel %vm465_vm0, %v1448_v62, %v669_v51  ;;  %v682_v2 = vsel %vm465_vm0, %v1449_v61, %v670_v52 }
 0x625   :  { %v1455_v1 = vpack.i.bf16 %v682_v2, %v679_v63 }
 0x627   :  { %1456 = vrot.lane.b32.xlu0 %v1455_v1, %s1567_s2 }
 0x691   :  { %v1452_v3 = vpop.permute.xlu1 %1451 }
 0x692   :  { %v1454_v8 = vunpack.i.h.bf16 %v1452_v3  ;;  %v1453_v9 = vunpack.i.l.bf16 %v1452_v3 }
 0x694   :  { %v691_v0 = vsel %vm465_vm0, %v1453_v9, %v667_v40  ;;  %v692_v11 = vsel %vm465_vm0, %v1454_v8, %v668_v41 }
 0x695   :  { %v1460_v12 = vpack.i.bf16 %v692_v11, %v691_v0 }
 0x697   :  { %1461 = vrot.lane.b32.xlu1 %v1460_v12, %s1561_s0  ;;  %v1529_v12 = vld [vmem:[%s2092_s1 + $0xe4] ss:$16 sps:$4 sm:$0xff]  }
 0x698   :  { %869 = vmatprep.subr.bf16.mxu1 %v1529_v12 }
 0x699   :  { %v1457_v13 = vpop.permute.xlu0 %1456 }
 0x69a   :  { %v1459_v14 = vunpack.i.h.bf16 %v1457_v13  ;;  %v1458_v15 = vunpack.i.l.bf16 %v1457_v13  ;;  %v1532_v13 = vld [vmem:[%s2092_s1 + $0xec] ss:$16 sps:$4 sm:$0xff]  }
 0x69b   :  { %922 = vmatprep.subr.bf16.mxu0 %v1532_v13 }
 0x69c   :  { %v693_v16 = vsel %vm465_vm0, %v1458_v15, %v669_v51  ;;  %v694_v17 = vsel %vm465_vm0, %v1459_v14, %v670_v52  ;;  %v1527_v14 = vld [vmem:[%s2092_s1 + $0xe0] ss:$16 sps:$4 sm:$0xff]   ;;  %v1530_v15 = vld [vmem:[%s2092_s1 + $0xe8] ss:$16 sps:$4 sm:$0xff]   ;;  %s1576_s1 = smov 96  }
 0x69d   :  { %v1465_v18 = vpack.i.bf16 %v694_v17, %v693_v16  ;;  %923 = vmatpush1.bf16.msra.mxu0 %v1530_v15 }
 0x69f   :  { %1466 = vrot.lane.b32.xlu0 %v1465_v18, %s1561_s0 }
 0x709   :  { %v1462_v19 = vpop.permute.xlu1 %1461 }
 0x70a   :  { %v1464_v20 = vunpack.i.h.bf16 %v1462_v19  ;;  %v1463_v21 = vunpack.i.l.bf16 %v1462_v19 }
 0x70c   :  { %v712_v22 = vmax.f32 %v668_v41, %v1464_v20  ;;  %v711_v23 = vmax.f32 %v667_v40, %v1463_v21 }
 0x70e   :  { %v1470_v24 = vpack.i.bf16 %v712_v22, %v711_v23 }
 0x710   :  { %1471 = vrot.lane.b32.xlu1 %v1470_v24, %s1567_s2 }
 0x711   :  { %v1467_v25 = vpop.permute.xlu0 %1466 }
 0x712   :  { %v1469_v26 = vunpack.i.h.bf16 %v1467_v25  ;;  %v1468_v27 = vunpack.i.l.bf16 %v1467_v25  ;;  %v987_v25 = vshra.s32 %v1636_v10, 5 }
 0x714   :  { %v714_v28 = vmax.f32 %v670_v52, %v1469_v26  ;;  %v713_v29 = vmax.f32 %v669_v51, %v1468_v27  ;;  %v986_v26 = vshra.s32 %v1615_v4, 5 }
 0x716   :  { %v1475_v30 = vpack.i.bf16 %v714_v28, %v713_v29 }
 0x718   :  { %1476 = vrot.lane.b32.xlu0 %v1475_v30, %s1567_s2  ;;  %v979_v30 = vadd.s32 24, %v1620_v6 }
 0x782   :  { %v1472_v31 = vpop.permute.xlu1 %1471 }
 0x783   :  { %v1474_v32 = vunpack.i.h.bf16 %v1472_v31  ;;  %v1473_v33 = vunpack.i.l.bf16 %v1472_v31 }
 0x785   :  { %v717_v34 = vsel %vm465_vm0, %v1473_v33, %v711_v23  ;;  %v720_v35 = vsel %vm465_vm0, %v1474_v32, %v712_v22 }
 0x786   :  { %v1480_v36 = vpack.i.bf16 %v720_v35, %v717_v34  ;;  %v981_v34 = vadd.s32 384, %v1615_v4 }
 0x788   :  { %1481 = vrot.lane.b32.xlu1 %v1480_v36, %s1567_s2  ;;  %v989_v44 = vshra.s32 %v981_v34, 5 }
 0x78a   :  { %v1477_v38 = vpop.permute.xlu0 %1476 }
 0x78b   :  { %v1479_v39 = vunpack.i.h.bf16 %v1477_v38  ;;  %v1478_v40 = vunpack.i.l.bf16 %v1477_v38 }
 0x78d   :  { %v723_v41 = vsel %vm465_vm0, %v1478_v40, %v713_v29  ;;  %v726_v42 = vsel %vm465_vm0, %v1479_v39, %v714_v28 }
 0x78e   :  { %v1485_v43 = vpack.i.bf16 %v726_v42, %v723_v41  ;;  %v985_v42 = vand.u32 15, %v979_v30 }
 0x790   :  { %1486 = vrot.lane.b32.xlu0 %v1485_v43, %s1567_s2  ;;  %v980_v43 = vadd.s32 256, %v1615_v4  ;;  %vm1003_vm13 = vcmp.eq.s32.totalorder %v985_v42, %v987_v25  ;;  %vm1002_vm11 = vcmp.eq.s32.totalorder %v985_v42, %v986_v26 }
 0x792   :  { %v988_v49 = vshra.s32 %v980_v43, 5 }
 0x7fa   :  { %v1482_v46 = vpop.permute.xlu1 %1481 }
 0x7fb   :  { %v1484_v47 = vunpack.i.h.bf16 %v1482_v46  ;;  %v1483_v48 = vunpack.i.l.bf16 %v1482_v46 }
 0x7fd   :  { %v735_v50 = vsel %vm465_vm0, %v1483_v48, %v711_v23  ;;  %v736_v51 = vsel %vm465_vm0, %v1484_v47, %v712_v22 }
 0x7fe   :  { %v1490_v52 = vpack.i.bf16 %v736_v51, %v735_v50 }
 0x800   :  { %1491 = vrot.lane.b32.xlu1 %v1490_v52, %s1574_s18  ;;  %v1575_v52 = vmov 0.0  }
 0x801   :  { %v1023_v4 = vsel %vm2133_vm10, 1.0, %v1575_v52 }
 0x802   :  { %v1487_v53 = vpop.permute.xlu0 %1486 }
 0x803   :  { %v1489_v54 = vunpack.i.h.bf16 %v1487_v53  ;;  %v1488_v55 = vunpack.i.l.bf16 %v1487_v53 }
 0x805   :  { %v737_v56 = vsel %vm465_vm0, %v1488_v55, %v713_v29  ;;  %v738_v57 = vsel %vm465_vm0, %v1489_v54, %v714_v28 }
 0x806   :  { %v1495_v58 = vpack.i.bf16 %v738_v57, %v737_v56 }
 0x808   :  { %1496 = vrot.lane.b32.xlu0 %v1495_v58, %s1574_s18 }
 0x872   :  { %v1492_v59 = vpop.permute.xlu1 %1491 }
 0x873   :  { %v1494_v60 = vunpack.i.h.bf16 %v1492_v59  ;;  %v1493_v61 = vunpack.i.l.bf16 %v1492_v59  ;;  %v1024_v59 = vpack.c.bf16 %v1023_v4, %v1023_v4 }
 0x875   :  { %v756_v62 = vmax.f32 %v712_v22, %v1494_v60  ;;  %v755_v63 = vmax.f32 %v711_v23, %v1493_v61  ;;  %v977_v22 = vadd.s32 8, %v1620_v6  ;;  %v2044_v23 = vand.u32 15, %v1620_v6 }
 0x877   :  { %v759_v2 = vpack.c.bf16 %v756_v62, %v755_v63  ;;  %v2046_v24 = vand.u32 15, %v977_v22  ;;  %vm991_vm0 = vcmp.eq.s32.totalorder %v2044_v23, %v987_v25  ;;  %vm990_vm9 = vcmp.eq.s32.totalorder %v2044_v23, %v986_v26 }
 0x878   :  { %vm993_vm1 = vcmp.eq.s32.totalorder %v2044_v23, %v989_v44 }
 0x879   :  { %1299 = vmatprep.mubr.msk.bf16.mxu1 %vm785_vm6, %v759_v2  ;;  %vm994_vm5 = vcmp.eq.s32.totalorder %v2046_v24, %v986_v26  ;;  %vm997_vm7 = vcmp.eq.s32.totalorder %v2046_v24, %v989_v44 }
 0x87a   :  { %v1497_v1 = vpop.permute.xlu0 %1496  ;;  %vm1239_vm3 = vmpackc.low %vm994_vm5, %vm990_vm9  ;;  %vm1005_vm5 = vcmp.eq.s32.totalorder %v985_v42, %v989_v44 }
 0x87b   :  { %v1499_v3 = vunpack.i.h.bf16 %v1497_v1  ;;  %v1498_v8 = vunpack.i.l.bf16 %v1497_v1  ;;  %v1262_v1 = vld [vmem:[%s2094_s3 + $0x30] ss:$0 sm:$0xff] }
 0x87d   :  { %v758_v9 = vmax.f32 %v714_v28, %v1499_v3  ;;  %v757_v0 = vmax.f32 %v713_v29, %v1498_v8  ;;  %v978_v29 = vadd.s32 16, %v1620_v6 }
 0x87f   :  { %v760_v11 = vpack.c.bf16 %v758_v9, %v757_v0  ;;  %v984_v41 = vand.u32 15, %v978_v29 }
 0x881   :  { %1300 = vmatmul.mubr.msk.bf16.vlgmr.msra.gmra.mrb[4].mxu1 %vm785_vm6, %v760_v11  ;;  %vm999_vm2 = vcmp.eq.s32.totalorder %v984_v41, %v987_v25  ;;  %vm998_vm4 = vcmp.eq.s32.totalorder %v984_v41, %v986_v26  ;;  %vm1249_vm6 = vmpackc.low %vm997_vm7, %vm993_vm1  ;;  %vm1001_vm9 = vcmp.eq.s32.totalorder %v984_v41, %v989_v44 }
 0x882   :  { %901 = vmatprep.mubr.bf16.mxu1 %v1565_v7  ;;  %870 = vmatpush1.bf16.msra.mxu1 %v1527_v14  ;;  %vm1242_vm15 = vmpackc.low %vm1003_vm13, %vm999_vm2  ;;  %vm1000_vm2 = vcmp.eq.s32.totalorder %v984_v41, %v988_v49  ;;  %vm1004_vm13 = vcmp.eq.s32.totalorder %v985_v42, %v988_v49 }
 0x883   :  { %vm1245_vm8 = vmpackc.low %vm1002_vm11, %vm998_vm4  ;;  %vm1133_vm11 = vcmask 254976  }
 0x884   :  { %vm1255_vm10 = vmpackc.low %vm1005_vm5, %vm1001_vm9 }
 0x885   :  { %vm1258_vm4 = vmpackc.low %vm1004_vm13, %vm1000_vm2 }
 0x954   :  { %v1301_v16 = vpop.f32.mrb[4].mxu1 }
 0x955   :  { %v826_v17 = vpop.f32.mrb[5].mxu1 }
 0x956   :  { %v1302_v18 = vpop.f32.mrb[6].mxu1 }
 0x957   :  { %v842_v19 = vpack.c.bf16 %v1302_v18, %v1301_v16  ;;  %v829_v20 = vpop.f32.mrb[7].mxu1 }
 0x958   :  { %v841_v21 = vpack.c.bf16 %v829_v20, %v826_v17 }
 0x95a   :  { %1232 = vmatmul.mubr.msk.bf16.vlgmr.msra.gmra.mrb[8].mxu1 %vm611_vm12, %v841_v21  ;;  %1234 = vmatmul.mubr.msk.bf16.vlgmr.msra.gmra.mrb[12].mxu0 %vm611_vm12, %v841_v21 }
 0x95b   :  { %911 = vmatprep.mubr.bf16.mxu1 %v1565_v7  ;;  %964 = vmatprep.mubr.bf16.mxu0 %v1565_v7 }
 0x962   :  { %1233 = vmatmul.mubr.msk.bf16.gmra.mrb[12].mxu1 %vm611_vm12, %v842_v19  ;;  %1235 = vmatmul.mubr.msk.bf16.gmra.mrb[16].mxu0 %vm611_vm12, %v842_v19  ;;  %vm995_vm12 = vcmp.eq.s32.totalorder %v2046_v24, %v987_v25 }
 0x963   :  { %1069 = vmatprep.mubr.bf16.mxu1 %v1565_v7  ;;  %vm1236_vm14 = vmpackc.low %vm995_vm12, %vm991_vm0  ;;  %vm992_vm0 = vcmp.eq.s32.totalorder %v2044_v23, %v988_v49  ;;  %vm996_vm12 = vcmp.eq.s32.totalorder %v2046_v24, %v988_v49 }
 0xa2d   :  { %v903_v27 = vpop.f32.mrb[8].mxu1  ;;  %v2050_v28 = vpop.f32.mrb[12].mxu0 }
 0xa2e   :  { %v905_v31 = vpop.f32.mrb[9].mxu1  ;;  %v958_v32 = vpop.f32.mrb[13].mxu0 }
 0xa2f   :  { %v907_v10 = vpop.f32.mrb[10].mxu1  ;;  %v960_v33 = vpop.f32.mrb[14].mxu0 }
 0xa30   :  { %v1240_v35 = vpack.c.bf16 %v907_v10, %v903_v27  ;;  %v1253_v36 = vpack.c.bf16 %v960_v33, %v2050_v28  ;;  %v909_v37 = vpop.f32.mrb[11].mxu1  ;;  %v962_v38 = vpop.f32.mrb[15].mxu0 }
 0xa31   :  { %v1237_v39 = vpack.c.bf16 %v909_v37, %v905_v31  ;;  %v1250_v40 = vpack.c.bf16 %v962_v38, %v958_v32 }
 0xa33   :  { %1238 = vmatprep.subr.msk.bf16.mxu1 %vm1236_vm14, %v1237_v39  ;;  %vm1033_vm14 = vcmask 261120  }
 0xa34   :  { %1241 = vmatpush1.bf16.msk.msra.mxu1 %vm1239_vm3, %v1240_v35  ;;  %vm1252_vm3 = vmpackc.low %vm996_vm12, %vm992_vm0 }
 0xa35   :  { %v913_v45 = vpop.f32.mrb[12].mxu1  ;;  %v966_v46 = vpop.f32.mrb[16].mxu0 }
 0xa36   :  { %v915_v47 = vpop.f32.mrb[13].mxu1  ;;  %v968_v48 = vpop.f32.mrb[17].mxu0 }
 0xa37   :  { %v917_v50 = vpop.f32.mrb[14].mxu1  ;;  %v970_v51 = vpop.f32.mrb[18].mxu0 }
 0xa38   :  { %v1246_v53 = vpack.c.bf16 %v917_v50, %v913_v45  ;;  %v1259_v54 = vpack.c.bf16 %v970_v51, %v966_v46  ;;  %v919_v55 = vpop.f32.mrb[15].mxu1  ;;  %v972_v56 = vpop.f32.mrb[19].mxu0 }
 0xa39   :  { %v1243_v57 = vpack.c.bf16 %v919_v55, %v915_v47  ;;  %v1256_v58 = vpack.c.bf16 %v972_v56, %v968_v48 }
 0xa3b   :  { %1244 = vmatprep.subr.msk.bf16.mxu1 %vm1242_vm15, %v1243_v57 }
 0xa3c   :  { %1247 = vmatpush1.bf16.msk.msra.mxu1 %vm1245_vm8, %v1246_v53 }
 0xa3d   :  { %1251 = vmatprep.subr.msk.bf16.mxu1 %vm1249_vm6, %v1250_v40 }
 0xa3f   :  { %1248 = vmatmul.mubr.msk.bf16.vlgmr.msra.gmra.mrb[16].mxu1 %vm1033_vm14, %v1024_v59 }
 0xa40   :  { %1254 = vmatpush1.bf16.msk.msra.mxu1 %vm1252_vm3, %v1253_v36  ;;  %1110 = vmatprep.mubr.bf16.mxu1 %v1565_v7 }
 0xa41   :  { %1257 = vmatprep.subr.msk.bf16.mxu1 %vm1255_vm10, %v1256_v58 }
 0xa44   :  { %1260 = vmatpush1.bf16.msk.msra.mxu1 %vm1258_vm4, %v1259_v54 }
 0xa4b   :  { %1261 = vmatmul.mubr.msk.bf16.vlgmr.msra.gmra.mrb[16].mxu1 %vm1033_vm14, %v1024_v59 }
 0xb1e   :  { %v1112_v5 = vpop.f32.mrb[16].mxu1 }
 0xb1f   :  { %v1114_v6 = vpop.f32.mrb[17].mxu1 }
 0xb20   :  { %v1121_v60 = vadd.f32 %v1114_v6, %v1112_v5  ;;  %v1116_v61 = vpop.f32.mrb[18].mxu1 }
 0xb21   :  { %v1117_v62 = vpop.f32.mrb[19].mxu1 }
 0xb22   :  { %1122 = vrot.lane.b32.xlu1 %v1121_v60, %s1567_s2 }
 0xb94   :  { %v1123_v63 = vpop.permute.xlu1 %1122 }
 0xb95   :  { %v1124_v2 = vadd.f32 %v1123_v63, %v1121_v60 }
 0xb97   :  { %1125 = vrot.lane.b32.xlu0 %v1124_v2, %s1576_s1 }
 0xc09   :  { %v1126_v7 = vpop.permute.xlu0 %1125 }
 0xc0a   :  { %v1127_v3 = vadd.f32 %v1126_v7, %v1124_v2 }
 0xc0c   :  { %v1132_v8 = vadd.f32 %v1262_v1, %v1127_v3 }
 0xc0e   :  { %1134 = vst.msk [vmem:[#allocation2] sm:$0x3] %vm1133_vm11, %v1132_v8 }
 0xc0f   :  { %1544 = shalt.err (!%p1541_p4)
}
 0xc10   :  { %s1545_s5 = scalar_lea.hbm %s2095_s4, 32 }
 0xc11   :  { %p1546_p5 = scmp.ne.s32.totalorder %s2095_s4, %s1545_s5  ;;  %p1549_p6 = scmp.lt.u32.totalorder %s1545_s5, %s2095_s4 }
 0xc13   :  { %p1551_p7 = pnand %p1549_p6, %p1546_p5 }
 0xc15   :  { %1554 = shalt.err (!%p1551_p7)
}
 0xc16   :  { %1144 = dma.vmem_to_hbm [thread:$0]  %s1142_s28, 32, %s2095_s4, [#allocation3]  }
 0xc17   :  { %1555 = dma.done.wait [#allocation3], 32  }
 0xc18   :  { %1556 = vsyncadd [#allocation3], 4294967264 }
 0xc19   :  { %1148 = vsyncpa [#allocation3], 1 }

</bundles_post_ra>
